<compile_context>
chip_gen: v7x
topology: tpu7x:2x2x1
jax: 0.10.0
libtpu: 0.0.40
codegen_flags: <defaults>
</compile_context>

<pallas_src>
import functools

import jax
import jax.numpy as jnp
from jax import lax
from jax.experimental import pallas as pl
from jax.experimental.pallas import tpu as pltpu

_LOSS_LANES = 128  # lane-dense per-tile partials row


def _glue_decoder_kernel(x_ref, w_ref, b_ref, labels_ref,
                         logits_ref, partials_ref,
                         *, tile_b, num_labels, batch_size):
    """One batch tile: logits = CLS @ W + b, plus per-tile CE partial sums.

    x_ref      : (tile_b, H)  CLS rows of this tile (auto-DMA'd, pipelined).
    w_ref      : (H, LP)      lane-padded transposed Linear weight (resident).
    b_ref      : (1, LP)      bias, padded columns = -1e30 (resident).
    labels_ref : (tile_b, 1)  int32 labels for this tile.
    logits_ref : (tile_b, LP) f32 out (lane-dense store).
    partials_ref : (1, 128)   f32 out; lane 0 = sum NLL, lane 1 = valid count.
    """
    i = pl.program_id(0)

    # Dropout(p=0.1) is identity in eval mode.
    # TODO(synk): training-mode dropout via pltpu.prng_* if needed.
    x = x_ref[...]                                          # (tile_b, H)
    w = w_ref[...]                                          # (H, LP)
    logits = jnp.dot(x.astype(w.dtype), w,
                     preferred_element_type=jnp.float32) + b_ref[...]
    logits_ref[...] = logits                                # lane-dense store

    # CrossEntropyLoss (num_labels > 1 branch).  Padded label columns carry a
    # -1e30 bias, so they drop out of the max / exp / sum below.
    m = jnp.max(logits, axis=-1, keepdims=True)             # (tile_b, 1)
    lse = m + jnp.log(jnp.sum(jnp.exp(logits - m), axis=-1, keepdims=True))

    labels = labels_ref[...]                                # (tile_b, 1) int32
    col = lax.broadcasted_iota(jnp.int32, logits.shape, 1)
    true_logit = jnp.sum(jnp.where(col == labels, logits, 0.0),
                         axis=-1, keepdims=True)            # (tile_b, 1)

    # Honor torch ignore_index=-100 (and any out-of-range label) plus the
    # row-validity mask for the (possibly OOB-padded) tail tile.
    row = lax.broadcasted_iota(jnp.int32, (tile_b, 1), 0) + i * tile_b
    valid = (labels >= 0) & (labels < num_labels) & (row < batch_size)
    nll = jnp.where(valid, lse - true_logit, 0.0)

    nll_sum = jnp.sum(nll, keepdims=True)                   # (1, 1)
    cnt = jnp.sum(valid.astype(jnp.float32), keepdims=True)  # (1, 1)

    lane = lax.broadcasted_iota(jnp.int32, (1, _LOSS_LANES), 1)
    partials_ref[...] = jnp.where(lane == 0, nll_sum,
                                  jnp.where(lane == 1, cnt, 0.0))


def prepare_glue_decoder_params(weight, bias, *, compute_dtype=jnp.bfloat16):
    """One-time (per-checkpoint) param prep: transpose + lane-pad the Linear head.

    weight: (num_labels, H) -- PyTorch nn.Linear convention.
    Returns (w_pad (H, LP) compute_dtype, b_pad (1, LP) f32), LP = round_up(L, 128).
    Padded bias columns are -1e30 so they are ignored by the in-kernel softmax/LSE.
    bf16 is the default compute dtype on all generations (f32 accumulation is
    kept inside the kernel via preferred_element_type).
    """
    num_labels, hidden = weight.shape
    lp = ((num_labels + 127) // 128) * 128
    w_pad = jnp.zeros((hidden, lp), compute_dtype)
    w_pad = w_pad.at[:, :num_labels].set(weight.T.astype(compute_dtype))
    b_pad = jnp.full((1, lp), -1e30, dtype=jnp.float32)
    b_pad = b_pad.at[0, :num_labels].set(bias.astype(jnp.float32))
    return w_pad, b_pad


def _round_up(x, m):
    return ((x + m - 1) // m) * m


@functools.partial(jax.jit, static_argnames=("num_labels", "trim_logits"))
def glue_decoder_forward(sequence_output, w_pad, b_pad, labels, *,
                         num_labels, trim_logits=True):
    """Pallas-backed GlueDecoder.forward (eval mode, classification branch).

    attention_mask is unused by the reference forward and deliberately kept out
    of the jitted signature.  Returns (logits (B, num_labels) f32, loss () f32).
    Set trim_logits=False to skip the (B, LP)->(B, num_labels) HBM slice when
    only the loss is consumed downstream.
    """
    B, S, H = sequence_output.shape
    assert H % 128 == 0, "hidden_size must be a multiple of 128"
    LP = w_pad.shape[1]

    # Bounded batch tiles keep the CLS-row DMA pipelined and VMEM in check for
    # any B (large tiles amortize per-grid-step overhead and grow the matmul M
    # dim against the resident weight; the VMEM estimate below guards v5e).
    tile_b = min(512, _round_up(B, 8))
    num_tiles = pl.cdiv(B, tile_b)

    # Free row-major reshape: CLS rows become lane-block 0 of each (S*H)-wide
    # row, so a plain BlockSpec (auto-pipelined) fetches exactly the CLS rows.
    seq2d = sequence_output.reshape(B, S * H)
    labels2 = labels.astype(jnp.int32).reshape(B, 1)

    # Raise the scoped-VMEM limit only when the double-buffered working set
    # needs it (e.g. v5e's 16 MiB default at large H).
    est = (2 * tile_b * H * sequence_output.dtype.itemsize   # CLS double buffer
           + H * LP * w_pad.dtype.itemsize                   # resident weight
           + 2 * LP * 4                                      # bias
           + 2 * tile_b * 4                                  # labels
           + 2 * tile_b * LP * 4                             # logits out blocks
           + 2 * _LOSS_LANES * 4)                            # partials
    vmem_limit = int(est * 1.5) if est > 12 * 1024 * 1024 else None

    kernel = functools.partial(_glue_decoder_kernel, tile_b=tile_b,
                               num_labels=num_labels, batch_size=B)

    logits_pad, partials = pl.pallas_call(
        kernel,
        grid=(num_tiles,),
        in_specs=[
            pl.BlockSpec((tile_b, H), lambda i: (i, 0)),     # CLS rows only
            pl.BlockSpec((H, LP), lambda i: (0, 0)),         # weight: resident
            pl.BlockSpec((1, LP), lambda i: (0, 0)),         # bias:   resident
            pl.BlockSpec((tile_b, 1), lambda i: (i, 0)),     # labels per tile
        ],
        out_specs=(
            pl.BlockSpec((tile_b, LP), lambda i: (i, 0)),    # lane-dense logits
            pl.BlockSpec((1, _LOSS_LANES), lambda i: (i, 0)),  # per-tile partials
        ),
        out_shape=(
            jax.ShapeDtypeStruct((B, LP), jnp.float32),
            jax.ShapeDtypeStruct((num_tiles, _LOSS_LANES), jnp.float32),
        ),
        compiler_params=pltpu.CompilerParams(
            dimension_semantics=("parallel",),   # independent tiles -> megacore
            vmem_limit_bytes=vmem_limit),
    )(seq2d, w_pad, b_pad, labels2)

    nll_total = jnp.sum(partials[:, 0])
    cnt_total = jnp.sum(partials[:, 1])
    # Matches torch.nn.CrossEntropyLoss(mean): NaN if every label is ignored.
    loss = nll_total / cnt_total

    logits = logits_pad[:, :num_labels] if trim_logits else logits_pad
    return logits, loss


# TODO(synk): num_labels == 1 regression branch (MSELoss) and the labels=None
# (loss-free) path are not implemented in-kernel; the classification
# (CrossEntropy) branch is the one implemented here.


def _reference_forward(sequence_output, weight_q, bias, labels, num_labels):
    """Pure-JAX reference mirroring the PyTorch module (eval mode), computed in
    f32 on the same (bf16-quantized) activations/weights fed to the kernel."""
    pooled = sequence_output[:, 0, :].astype(jnp.float32)
    logits = jnp.dot(pooled, weight_q.astype(jnp.float32).T,
                     precision=lax.Precision.HIGHEST) + bias.astype(jnp.float32)
    labels = labels.astype(jnp.int32)
    valid = (labels >= 0) & (labels < num_labels)
    lse = jax.nn.logsumexp(logits, axis=-1)
    safe_labels = jnp.where(valid, labels, 0)
    true_logit = jnp.take_along_axis(logits, safe_labels[:, None], axis=-1)[:, 0]
    nll = jnp.where(valid, lse - true_logit, 0.0)
    loss = jnp.sum(nll) / jnp.sum(valid.astype(jnp.float32))
    return logits, loss


if __name__ == "__main__":
    key = jax.random.PRNGKey(0)
    B, S, H = 8, 8, 128
    num_labels = 3  # e.g. task_label_map["mnli"] == 3

    k_seq, k_w, k_b, k_lab = jax.random.split(key, 4)
    # Encoder output is assumed bf16 (halves the dominant HBM read everywhere).
    sequence_output = jax.random.normal(k_seq, (B, S, H),
                                        dtype=jnp.float32).astype(jnp.bfloat16)
    # attention_mask is unused by GlueDecoder.forward -> intentionally not built
    # or staged into the jitted call.

    # nn.Linear(hidden_size, num_labels) default init: U(-1/sqrt(H), 1/sqrt(H))
    bound = 1.0 / (H ** 0.5)
    weight = jax.random.uniform(k_w, (num_labels, H), jnp.float32,
                                minval=-bound, maxval=bound)
    bias = jax.random.uniform(k_b, (num_labels,), jnp.float32,
                              minval=-bound, maxval=bound)
    labels = jax.random.randint(k_lab, (B,), 0, num_labels, dtype=jnp.int32)
    labels = labels.at[0].set(-100)  # exercise ignore_index handling

    # One-time param prep (outside the per-call jit); bf16 compute by default.
    w_pad, b_pad = prepare_glue_decoder_params(weight, bias)

    logits, loss = glue_decoder_forward(sequence_output, w_pad, b_pad, labels,
                                        num_labels=num_labels)
    jax.block_until_ready((logits, loss))

    # Reference uses the same bf16-quantized weight / activations, f32 math.
    weight_q = weight.astype(jnp.bfloat16)
    ref_logits, ref_loss = _reference_forward(sequence_output, weight_q, bias,
                                              labels, num_labels)
    assert jnp.allclose(logits, ref_logits, atol=1e-3, rtol=1e-3), (
        float(jnp.max(jnp.abs(logits - ref_logits))))
    assert jnp.allclose(loss, ref_loss, atol=1e-3, rtol=1e-3), (
        float(jnp.abs(loss - ref_loss)))

    print("KERNEL_OK")
</pallas_src>

<mosaic_0001>
module attributes {stable_mosaic.version = 11 : i64} {
  func.func @_glue_decoder_kernel(%arg0: i32, %arg1: memref<8x128xbf16, #tpu.memory_space<vmem>>, %arg2: memref<128x128xbf16, #tpu.memory_space<vmem>>, %arg3: memref<1x128xf32, #tpu.memory_space<vmem>>, %arg4: memref<8x1xi32, #tpu.memory_space<vmem>>, %arg5: memref<8x128xf32, #tpu.memory_space<vmem>>, %arg6: memref<1x128xf32, #tpu.memory_space<vmem>>) attributes {dimension_semantics = [#tpu.dimension_semantics<parallel>], iteration_bounds = array<i64: 1>, scalar_prefetch = 0 : i64, scratch_operands = 0 : i64, tpu.core_type = #tpu.core_type<tc>, window_params = [{transform_indices = @transform_0, window_bounds = array<i64: 8, 128>}, {pipeline_mode = #tpu.pipeline_mode<synchronous>, transform_indices = @transform_1, window_bounds = array<i64: 128, 128>}, {pipeline_mode = #tpu.pipeline_mode<synchronous>, transform_indices = @transform_2, window_bounds = array<i64: 1, 128>}, {transform_indices = @transform_3, window_bounds = array<i64: 8, 1>}, {transform_indices = @transform_4, window_bounds = array<i64: 8, 128>}, {transform_indices = @transform_5, window_bounds = array<i64: 1, 128>}]} {
    %c0 = arith.constant 0 : index
    %c0_0 = arith.constant 0 : index
    %0 = vector.load %arg1[%c0, %c0_0] : memref<8x128xbf16, #tpu.memory_space<vmem>>, vector<8x128xbf16>
    %c0_1 = arith.constant 0 : index
    %c0_2 = arith.constant 0 : index
    %1 = vector.load %arg2[%c0_1, %c0_2] : memref<128x128xbf16, #tpu.memory_space<vmem>>, vector<128x128xbf16>
    %cst = arith.constant dense<0.000000e+00> : vector<8x128xf32>
    %2 = tpu.matmul %0, %1, %cst {dimension_numbers = #tpu.dot_dimension_numbers<[1], [0], [0], [1], [0, 0, 1, 1], [], []>} : vector<8x128xbf16>, vector<128x128xbf16>, vector<8x128xf32> -> vector<8x128xf32>
    %c0_3 = arith.constant 0 : index
    %c0_4 = arith.constant 0 : index
    %3 = vector.load %arg3[%c0_3, %c0_4] : memref<1x128xf32, #tpu.memory_space<vmem>>, vector<1x128xf32>
    %4 = vector.broadcast %3 : vector<1x128xf32> to vector<8x128xf32>
    %5 = arith.addf %2, %4 : vector<8x128xf32>
    %c0_5 = arith.constant 0 : index
    %c0_6 = arith.constant 0 : index
    %6 = vector.load %arg5[%c0_5, %c0_6] : memref<8x128xf32, #tpu.memory_space<vmem>>, vector<8x128xf32>
    tpu.vector_store %arg5[%c0_5, %c0_6], %5 {strides = array<i32>} : memref<8x128xf32, #tpu.memory_space<vmem>>, vector<8x128xf32>,
    %cst_7 = arith.constant dense<0xFF800000> : vector<8xf32>
    %7 = vector.multi_reduction <maximumf>, %5, %cst_7 [1] : vector<8x128xf32> to vector<8xf32>
    %8 = vector.shape_cast %7 : vector<8xf32> to vector<8x1xf32>
    %9 = vector.broadcast %8 : vector<8x1xf32> to vector<8x128xf32>
    %10 = arith.subf %5, %9 : vector<8x128xf32>
    %11 = math.exp %10 : vector<8x128xf32>
    %cst_8 = arith.constant dense<0.000000e+00> : vector<8xf32>
    %12 = vector.multi_reduction <add>, %11, %cst_8 [1] : vector<8x128xf32> to vector<8xf32>
    %13 = vector.shape_cast %12 : vector<8xf32> to vector<8x1xf32>
    %14 = math.log %13 : vector<8x1xf32>
    %15 = arith.addf %8, %14 : vector<8x1xf32>
    %c0_9 = arith.constant 0 : index
    %c0_10 = arith.constant 0 : index
    %16 = vector.load %arg4[%c0_9, %c0_10] : memref<8x1xi32, #tpu.memory_space<vmem>>, vector<8x1xi32>
    %17 = tpu.iota {dimensions = array<i32: 1>} : vector<8x128xi32>
    %18 = vector.broadcast %16 : vector<8x1xi32> to vector<8x128xi32>
    %19 = arith.cmpi eq, %17, %18 : vector<8x128xi32>
    %cst_11 = arith.constant 0.000000e+00 : f32
    %20 = vector.broadcast %cst_11 : f32 to vector<8x128xf32>
    %21 = arith.select %19, %5, %20 : vector<8x128xi1>, vector<8x128xf32>
    %cst_12 = arith.constant dense<0.000000e+00> : vector<8xf32>
    %22 = vector.multi_reduction <add>, %21, %cst_12 [1] : vector<8x128xf32> to vector<8xf32>
    %23 = vector.shape_cast %22 : vector<8xf32> to vector<8x1xf32>
    %24 = tpu.iota {dimensions = array<i32: 0>} : vector<8x1xi32>
    %c8_i32 = arith.constant 8 : i32
    %25 = arith.muli %arg0, %c8_i32 : i32
    %26 = vector.broadcast %25 : i32 to vector<8x1xi32>
    %27 = arith.addi %24, %26 : vector<8x1xi32>
    %c0_i32 = arith.constant 0 : i32
    %28 = vector.broadcast %c0_i32 : i32 to vector<8x1xi32>
    %29 = arith.cmpi sge, %16, %28 : vector<8x1xi32>
    %c3_i32 = arith.constant 3 : i32
    %30 = vector.broadcast %c3_i32 : i32 to vector<8x1xi32>
    %31 = arith.cmpi slt, %16, %30 : vector<8x1xi32>
    %32 = arith.andi %29, %31 : vector<8x1xi1>
    %c8_i32_13 = arith.constant 8 : i32
    %33 = vector.broadcast %c8_i32_13 : i32 to vector<8x1xi32>
    %34 = arith.cmpi slt, %27, %33 : vector<8x1xi32>
    %35 = arith.andi %32, %34 : vector<8x1xi1>
    %36 = arith.subf %15, %23 : vector<8x1xf32>
    %cst_14 = arith.constant 0.000000e+00 : f32
    %37 = vector.broadcast %cst_14 : f32 to vector<8x1xf32>
    %38 = arith.select %35, %36, %37 : vector<8x1xi1>, vector<8x1xf32>
    %39 = vector.shape_cast %38 : vector<8x1xf32> to vector<1x8x1xf32>
    %cst_15 = arith.constant dense<0.000000e+00> : vector<1xf32>
    %40 = vector.multi_reduction <add>, %39, %cst_15 [1, 2] : vector<1x8x1xf32> to vector<1xf32>
    %41 = vector.shape_cast %40 : vector<1xf32> to vector<1x1x1xf32>
    %42 = vector.extract %41[0, 0, 0] : f32 from vector<1x1x1xf32>
    %43 = vector.broadcast %42 : f32 to vector<1x1xf32>
    %44 = arith.extui %35 : vector<8x1xi1> to vector<8x1xi32>
    %45 = arith.sitofp %44 : vector<8x1xi32> to vector<8x1xf32>
    %46 = vector.shape_cast %45 : vector<8x1xf32> to vector<1x8x1xf32>
    %cst_16 = arith.constant dense<0.000000e+00> : vector<1xf32>
    %47 = vector.multi_reduction <add>, %46, %cst_16 [1, 2] : vector<1x8x1xf32> to vector<1xf32>
    %48 = vector.shape_cast %47 : vector<1xf32> to vector<1x1x1xf32>
    %49 = vector.extract %48[0, 0, 0] : f32 from vector<1x1x1xf32>
    %50 = vector.broadcast %49 : f32 to vector<1x1xf32>
    %51 = tpu.iota {dimensions = array<i32: 1>} : vector<1x128xi32>
    %c0_i32_17 = arith.constant 0 : i32
    %52 = vector.broadcast %c0_i32_17 : i32 to vector<1x128xi32>
    %53 = arith.cmpi eq, %51, %52 : vector<1x128xi32>
    %c1_i32 = arith.constant 1 : i32
    %54 = vector.broadcast %c1_i32 : i32 to vector<1x128xi32>
    %55 = arith.cmpi eq, %51, %54 : vector<1x128xi32>
    %cst_18 = arith.constant 0.000000e+00 : f32
    %56 = vector.shape_cast %50 : vector<1x1xf32> to vector<1x1xf32>
    %57 = vector.broadcast %56 : vector<1x1xf32> to vector<1x128xf32>
    %58 = vector.broadcast %cst_18 : f32 to vector<1x128xf32>
    %59 = arith.select %55, %57, %58 : vector<1x128xi1>, vector<1x128xf32>
    %60 = vector.shape_cast %43 : vector<1x1xf32> to vector<1x1xf32>
    %61 = vector.broadcast %60 : vector<1x1xf32> to vector<1x128xf32>
    %62 = arith.select %53, %61, %59 : vector<1x128xi1>, vector<1x128xf32>
    %c0_19 = arith.constant 0 : index
    %c0_20 = arith.constant 0 : index
    %63 = vector.load %arg6[%c0_19, %c0_20] : memref<1x128xf32, #tpu.memory_space<vmem>>, vector<1x128xf32>
    tpu.vector_store %arg6[%c0_19, %c0_20], %62 {strides = array<i32>} : memref<1x128xf32, #tpu.memory_space<vmem>>, vector<1x128xf32>,
    return
  }
  func.func @transform_0(%arg0: i32) -> (i32, i32) {
    %c0_i32 = arith.constant 0 : i32
    %c0_i32_0 = arith.constant 0 : i32
    return %arg0, %c0_i32 : i32, i32
  }
  func.func @transform_1(%arg0: i32) -> (i32, i32) {
    %c0_i32 = arith.constant 0 : i32
    %c0_i32_0 = arith.constant 0 : i32
    %c0_i32_1 = arith.constant 0 : i32
    return %c0_i32, %c0_i32_0 : i32, i32
  }
  func.func @transform_2(%arg0: i32) -> (i32, i32) {
    %c0_i32 = arith.constant 0 : i32
    %c0_i32_0 = arith.constant 0 : i32
    %c0_i32_1 = arith.constant 0 : i32
    return %c0_i32, %c0_i32_0 : i32, i32
  }
  func.func @transform_3(%arg0: i32) -> (i32, i32) {
    %c0_i32 = arith.constant 0 : i32
    %c0_i32_0 = arith.constant 0 : i32
    return %arg0, %c0_i32 : i32, i32
  }
  func.func @transform_4(%arg0: i32) -> (i32, i32) {
    %c0_i32 = arith.constant 0 : i32
    %c0_i32_0 = arith.constant 0 : i32
    return %arg0, %c0_i32 : i32, i32
  }
  func.func @transform_5(%arg0: i32) -> (i32, i32) {
    %c0_i32 = arith.constant 0 : i32
    %c0_i32_0 = arith.constant 0 : i32
    return %arg0, %c0_i32 : i32, i32
  }
}

</mosaic_0001>

<bundles_post_ra>
// kernel: glue_decoder_forward.1
= control target key start
LH: loop header
LB: loop body
LE: loop exit
PB: predicated region body
PF: predicated region fallthrough
CT: control target
= control target key end

     0   :  { %v262_v0 = vmov 0.0   ;;  %vm263_vm0 = vmmov 0   ;;  %v264_v10 = vmov 0   ;;  %v144_v21 = vlaneseq  ;;  %s344_s1 = inlined_call_operand.vmem [shape: bf16[128,128], index: 1, kind: input, shape index: {}]   ;;  %s345_s0 = inlined_call_operand.vmem [shape: bf16[8,1024], index: 0, kind: input, shape index: {}]   ;;  %s346_s2 = inlined_call_operand.vmem [shape: f32[1,128], index: 2, kind: input, shape index: {}]   ;;  %s347_s4 = inlined_call_operand.vmem [shape: f32[8,128], index: 4, kind: output, shape index: {0}]   ;;  %s348_s3 = inlined_call_operand.vmem [shape: s32[8,1], index: 3, kind: input, shape index: {}]   ;;  %s349_s5 = inlined_call_operand.vmem [shape: f32[1,128], index: 5, kind: output, shape index: {1}]  }
   0x1   :  { %222 = vmatprep.subr.bf16.mxu0 %v262_v0  ;;  %v250_v1 = vld [vmem:[%s344_s1] sm:$0xff]   ;;  %238 = vmatprep.mubr.msk.bf16.mxu0 %vm263_vm0, %v262_v0  ;;  %v251_v2 = vld [vmem:[%s344_s1 + $0x8] sm:$0xff]   ;;  %v252_v3 = vld [vmem:[%s344_s1 + $0x10] sm:$0xff]   ;;  %vm165_vm5 = vcmask 7168  }
   0x2   :  { %223 = vmatpush3.bf16.msra.mxu0 %v250_v1  ;;  %v253_v4 = vld [vmem:[%s344_s1 + $0x18] sm:$0xff]   ;;  %v254_v5 = vld [vmem:[%s344_s1 + $0x20] sm:$0xff]   ;;  %v255_v6 = vld [vmem:[%s344_s1 + $0x28] sm:$0xff]   ;;  %249 = vset.pattern.permute.xlu0 %v264_v10  ;;  %v145_v22 = vand.u32 127, %v144_v21 }
   0x3   :  { %224 = vmatprep.subr.bf16.mxu0 %v262_v0  ;;  %v256_v7 = vld [vmem:[%s344_s1 + $0x30] sm:$0xff]   ;;  %v257_v8 = vld [vmem:[%s344_s1 + $0x38] sm:$0xff]   ;;  %v20_v9 = vld [vmem:[%s345_s0] sm:$0xf] }
   0x4   :  { %v203_v11 = vld [vmem:[%s346_s2] ss:$0 sm:$0xff]  ;;  %vm189_vm6 = vcmp.eq.s32.totalorder %v145_v22, 1  ;;  %vm188_vm7 = vcmp.eq.s32.totalorder %v145_v22, 0 }
   0x5   :  { %v143_v17 = vld [vmem:[%s348_s3] sm:$0xff] }
   0x6   :  { %225 = vmatpush3.bf16.msra.mxu0 %v251_v2  ;;  %vm158_vm2 = vcmp.ge.s32.totalorder %v143_v17, 0  ;;  %vm159_vm3 = vcmp.lt.s32.totalorder %v143_v17, 3 }
   0x7   :  { %226 = vmatprep.subr.bf16.mxu0 %v262_v0  ;;  %vm160_vm4 = vmand %vm158_vm2, %vm159_vm3 }
   0x8   :  { %v212_v33 = vsel %vm160_vm4, 1.0, %v262_v0 }
   0x9   :  { %v178_v35 = vsel %vm165_vm5, %v212_v33, 0.0 }
   0xa   :  { %227 = vmatpush3.bf16.msra.mxu0 %v252_v3 }
   0xb   :  { %228 = vmatprep.subr.bf16.mxu0 %v262_v0 }
   0xe   :  { %229 = vmatpush3.bf16.msra.mxu0 %v253_v4 }
   0xf   :  { %230 = vmatprep.subr.bf16.mxu0 %v262_v0 }
  0x12   :  { %231 = vmatpush3.bf16.msra.mxu0 %v254_v5 }
  0x13   :  { %232 = vmatprep.subr.bf16.mxu0 %v262_v0 }
  0x16   :  { %233 = vmatpush3.bf16.msra.mxu0 %v255_v6 }
  0x17   :  { %234 = vmatprep.subr.bf16.mxu0 %v262_v0 }
  0x1a   :  { %235 = vmatpush3.bf16.msra.mxu0 %v256_v7 }
  0x1b   :  { %236 = vmatprep.subr.bf16.mxu0 %v262_v0 }
  0x1e   :  { %237 = vmatpush3.bf16.msra.mxu0 %v257_v8 }
  0x21   :  { %239 = vmatmul.mubr.bf16.vlgmr.msra.gmra.mrb[0].mxu0 %v20_v9 }
  0xf4   :  { %v126_v12 = vpop.f32.mrb[0].mxu0 }
  0xf5   :  { %v127_v13 = vadd.f32 %v203_v11, %v126_v12  ;;  %v240_v14 = vpop.f32.mrb[1].mxu0 }
  0xf6   :  { %v129_v15 = vpop.f32.mrb[2].mxu0 }
  0xf7   :  { %132 = vst [vmem:[%s347_s4] sm:$0xff] %v127_v13  ;;  %133 = vmax.xlane.f32.xlu0 %v127_v13  ;;  %v241_v16 = vpop.f32.mrb[3].mxu0 }
 0x10d   :  { %147 = vperm.xlu0 %249, %v143_v17  }
 0x184   :  { %v134_v18 = vpop.xlane.xlu0 %133 }
 0x185   :  { %v135_v19 = vsub.f32 %v127_v13, %v134_v18 }
 0x187   :  { %v136_v20 = vmul.f32 1.442695, %v135_v19 }
 0x189   :  { %258 = vpow2.f32 %v136_v20 }
 0x18c   :  { %v148_v23 = vpop.permute.xlu0 %147 }
 0x18d   :  { %vm149_vm1 = vcmp.eq.s32.totalorder %v145_v22, %v148_v23 }
 0x18e   :  { %v150_v25 = vsel %vm149_vm1, %v127_v13, 0.0 }
 0x193   :  { %v259_v24 = vpop.eup %258 }
 0x194   :  { %138 = vadd.xlane.f32.xlu1 %v259_v24 }
 0x198   :  { %151 = vadd.xlane.f32.xlu1 %v150_v25 }
 0x221   :  { %v139_v26 = vpop.xlane.xlu1 %138 }
 0x222   :  { %260 = vlog2.f32 %v139_v26 }
 0x225   :  { %v152_v30 = vpop.xlane.xlu1 %151 }
 0x22c   :  { %v261_v27 = vpop.eup %260 }
 0x22d   :  { %v141_v28 = vmul.f32 0.6931472, %v261_v27 }
 0x22f   :  { %v142_v29 = vadd.f32 %v141_v28, %v134_v18 }
 0x231   :  { %v163_v31 = vsub.f32 %v142_v29, %v152_v30 }
 0x233   :  { %v164_v32 = vsel %vm160_vm4, %v163_v31, 0.0 }
 0x234   :  { %v166_v34 = vsel %vm165_vm5, %v164_v32, 0.0 }
 0x235   :  { %167 = vadd.xlane.f32.xlu1 %v166_v34 }
 0x239   :  { %179 = vadd.xlane.f32.xlu1 %v178_v35 }
 0x2c2   :  { %v168_v36 = vpop.xlane.xlu1 %167 }
 0x2c3   :  { %v169_v37 = vrot.slane %v168_v36, 4 }
 0x2c5   :  { %v170_v38 = vadd.f32 %v169_v37, %v168_v36 }
 0x2c6   :  { %v180_v39 = vpop.xlane.xlu1 %179 }
 0x2c7   :  { %v171_v40 = vrot.slane %v170_v38, 2  ;;  %v181_v41 = vrot.slane %v180_v39, 4 }
 0x2c9   :  { %v182_v42 = vadd.f32 %v181_v41, %v180_v39  ;;  %v172_v43 = vadd.f32 %v171_v40, %v170_v38 }
 0x2cb   :  { %v183_v44 = vrot.slane %v182_v42, 2  ;;  %v173_v45 = vrot.slane %v172_v43, 1 }
 0x2cd   :  { %v184_v46 = vadd.f32 %v183_v44, %v182_v42  ;;  %v174_v47 = vadd.f32 %v173_v45, %v172_v43 }
 0x2cf   :  { %242 = vpush %v174_v47  ;;  %v185_v48 = vrot.slane %v184_v46, 1 }
 0x2d1   :  { %v186_v49 = vadd.f32 %v185_v48, %v184_v46 }
 0x2d3   :  { %244 = vpush %v186_v49 }
 0x300   :  { %s243_s0 = spop %242 }
 0x301   :  { %v192_v51 = vstv %s243_s0 }
 0x304   :  { %s245_s2 = spop %244 }
 0x305   :  { %v190_v50 = vstv %s245_s2 }
 0x306   :  { %v191_v52 = vsel %vm189_vm6, %v190_v50, 0.0 }
 0x307   :  { %v193_v53 = vsel %vm188_vm7, %v192_v51, %v191_v52 }
 0x308   :  { %194 = vst [vmem:[%s349_s5] sm:$0x1] %v193_v53 }

</bundles_post_ra>
